<compile_context>
chip_gen: v6e
topology: v6e:2x2x1
jax: 0.10.0
libtpu: 0.0.40
codegen_flags: <defaults>
</compile_context>

<pallas_src>
import jax
import jax.numpy as jnp
from jax import lax
from jax.experimental import pallas as pl
from jax.experimental.pallas import tpu as pltpu

EPS = 1e-5          # PyTorch BatchNorm2d default
LANES = 128         # TPU lane width; Cout is padded to this for lane-dense stores
VMEM_LIMIT = 32 * 1024 * 1024   # safe scoped-VMEM limit on v5e/v6e/v7x


def conv_stats_kernel(a_ref, w_ref, stats_ref):
    """Phase 1: conv tile + per-tile sum / sum-of-squares (single-pass stats).

    a_ref: (TM, K) bf16 im2col tile, w_ref: (K, Cpad) bf16, stats_ref: (8, Cpad) f32.
    Row 0 of stats = sum_m y, row 1 = sum_m y^2, rows 2..7 = 0.
    """
    y = jnp.dot(a_ref[...], w_ref[...], preferred_element_type=jnp.float32)
    s = jnp.sum(y, axis=0, keepdims=True)          # (1, Cpad)
    ss = jnp.sum(y * y, axis=0, keepdims=True)     # (1, Cpad)
    row = lax.broadcasted_iota(jnp.int32, stats_ref.shape, 0)
    stats_ref[...] = jnp.where(row == 0, s, jnp.where(row == 1, ss, 0.0))


def conv_bn_relu_kernel(a_ref, w_ref, scale_ref, bias_ref, o_ref):
    """Phase 2: recompute conv tile, apply folded BN (scale/bias) + ReLU."""
    y = jnp.dot(a_ref[...], w_ref[...], preferred_element_type=jnp.float32)
    out = jnp.maximum(y * scale_ref[...] + bias_ref[...], 0.0)
    o_ref[...] = out.astype(o_ref.dtype)


def _im2col_3x3_same(x_nhwc):
    """x_nhwc: (N, H, W, Cin) -> (N*H*W, 9*Cin). Pure layout glue (kept in bf16)."""
    n, h, w, cin = x_nhwc.shape
    xp = jnp.pad(x_nhwc, ((0, 0), (1, 1), (1, 1), (0, 0)))
    taps = []
    for ky in range(3):
        for kx in range(3):
            taps.append(xp[:, ky:ky + h, kx:kx + w, :])     # (N, H, W, Cin)
    p = jnp.stack(taps, axis=3)                             # (N, H, W, 9, Cin)
    return p.reshape(n * h * w, 9 * cin)


def conv_block_forward(x_nchw, conv_w, gamma, beta, *, tile_m=256):
    """x_nchw: (N, Cin, H, W); conv_w: (Cout, Cin, 3, 3); gamma/beta: (Cout,).

    tile_m (multiple of 16) is sized conservatively: per-tile VMEM here is
    ~tile_m*(2K + 4*Cpad) bytes double-buffered, far under the 32 MiB scoped limit
    (and under v7x's 64 MiB physical VMEM). Raise tile_m for larger problems.
    """
    n, cin, h, w = x_nchw.shape
    cout = conv_w.shape[0]
    k = 9 * cin
    cpad = ((cout + LANES - 1) // LANES) * LANES            # lane-dense Cout

    # NCHW -> NHWC, bf16 activations for the MXU (accumulation stays f32 in-kernel).
    x_nhwc = jnp.transpose(x_nchw, (0, 2, 3, 1)).astype(jnp.bfloat16)
    a = _im2col_3x3_same(x_nhwc)                            # (M, 9*Cin) bf16

    m = n * h * w
    n_tiles = pl.cdiv(m, tile_m)
    m_pad = n_tiles * tile_m
    if m_pad != m:
        # Zero rows contribute 0 to sum/sumsq and are sliced off; stats use true M.
        a = jnp.pad(a, ((0, m_pad - m), (0, 0)))

    # (Cout, Cin, KH, KW) -> (KH, KW, Cin, Cout) -> (9*Cin, Cout), zero-pad to Cpad lanes.
    w_mat = jnp.transpose(conv_w, (2, 3, 1, 0)).reshape(k, cout).astype(jnp.bfloat16)
    w_mat = jnp.pad(w_mat, ((0, 0), (0, cpad - cout)))

    compiler_params = pltpu.CompilerParams(
        dimension_semantics=("parallel",),                  # M tiles independent -> megacore on v7x
        vmem_limit_bytes=VMEM_LIMIT)

    # ---- Phase 1: conv + per-tile partial statistics -------------------------------
    partials = pl.pallas_call(
        conv_stats_kernel,
        out_shape=jax.ShapeDtypeStruct((n_tiles * 8, cpad), jnp.float32),
        grid_spec=pltpu.PrefetchScalarGridSpec(
            num_scalar_prefetch=0,
            grid=(n_tiles,),
            in_specs=[
                pl.BlockSpec((tile_m, k), lambda i: (i, 0)),
                pl.BlockSpec((k, cpad), lambda i: (0, 0)),
            ],
            out_specs=pl.BlockSpec((8, cpad), lambda i: (i, 0))),
        compiler_params=compiler_params,
    )(a, w_mat)

    # Tiny per-channel finish (n_tiles x Cpad) in XLA: fold BN into scale/bias.
    part = partials.reshape(n_tiles, 8, cpad)
    total = jnp.sum(part[:, 0, :], axis=0)                  # sum_m y
    total_sq = jnp.sum(part[:, 1, :], axis=0)               # sum_m y^2
    mean = total / m
    var = jnp.maximum(total_sq / m - mean * mean, 0.0)      # biased variance (training-mode BN)
    gamma_p = jnp.pad(gamma.astype(jnp.float32), (0, cpad - cout))
    beta_p = jnp.pad(beta.astype(jnp.float32), (0, cpad - cout))
    scale = (gamma_p * lax.rsqrt(var + EPS)).reshape(1, cpad)
    bias = (beta_p - mean * scale[0]).reshape(1, cpad)

    # ---- Phase 2: conv recompute + fused scale/bias + ReLU, lane-dense output ------
    y = pl.pallas_call(
        conv_bn_relu_kernel,
        out_shape=jax.ShapeDtypeStruct((m_pad, cpad), jnp.float32),
        grid_spec=pltpu.PrefetchScalarGridSpec(
            num_scalar_prefetch=0,
            grid=(n_tiles,),
            in_specs=[
                pl.BlockSpec((tile_m, k), lambda i: (i, 0)),
                pl.BlockSpec((k, cpad), lambda i: (0, 0)),
                pl.BlockSpec((1, cpad), lambda i: (0, 0)),
                pl.BlockSpec((1, cpad), lambda i: (0, 0)),
            ],
            out_specs=pl.BlockSpec((tile_m, cpad), lambda i: (i, 0))),
        compiler_params=compiler_params,
    )(a, w_mat, scale, bias)

    y_nhwc = y[:m, :cout].reshape(n, h, w, cout)
    return jnp.transpose(y_nhwc, (0, 3, 1, 2))              # back to NCHW


def reference_forward(x_nchw, conv_w, gamma, beta):
    """Pure-JAX reference (training-mode BN); conv uses the same bf16-in / f32-acc path."""
    y = lax.conv_general_dilated(
        x_nchw.astype(jnp.bfloat16), conv_w.astype(jnp.bfloat16),
        window_strides=(1, 1), padding=((1, 1), (1, 1)),
        dimension_numbers=("NCHW", "OIHW", "NCHW"),
        preferred_element_type=jnp.float32)
    mean = jnp.mean(y, axis=(0, 2, 3), keepdims=True)
    var = jnp.mean((y - mean) ** 2, axis=(0, 2, 3), keepdims=True)
    yn = (y - mean) / jnp.sqrt(var + EPS)
    out = yn * gamma.reshape(1, -1, 1, 1) + beta.reshape(1, -1, 1, 1)
    return jnp.maximum(out, 0.0)


if __name__ == "__main__":
    key = jax.random.PRNGKey(0)
    n, cin, h, w = 2, 4, 16, 16
    cout = 8  # n_conv_filters

    k_x, k_w = jax.random.split(key)
    x = jax.random.normal(k_x, (n, cin, h, w), dtype=jnp.float32)
    # Conv has bias=False; BN affine defaults: weight=1, bias=0.
    conv_w = jax.random.normal(k_w, (cout, cin, 3, 3), dtype=jnp.float32) * 0.1
    gamma = jnp.ones((cout,), dtype=jnp.float32)
    beta = jnp.zeros((cout,), dtype=jnp.float32)

    out = conv_block_forward(x, conv_w, gamma, beta, tile_m=256)  # 2 M-tiles at this size
    out = jax.block_until_ready(out)

    ref = jax.block_until_ready(reference_forward(x, conv_w, gamma, beta))
    if not jnp.allclose(out, ref, atol=1e-3, rtol=1e-3):
        raise AssertionError("Pallas ConvBlock output mismatch vs reference")

    print("KERNEL_OK")
</pallas_src>

<mosaic_0001>
module attributes {stable_mosaic.version = 11 : i64} {
  func.func @conv_stats_kernel(%arg0: i32, %arg1: memref<256x36xbf16, #tpu.memory_space<vmem>>, %arg2: memref<36x128xbf16, #tpu.memory_space<vmem>>, %arg3: memref<8x128xf32, #tpu.memory_space<vmem>>) attributes {dimension_semantics = [#tpu.dimension_semantics<parallel>], iteration_bounds = array<i64: 2>, scalar_prefetch = 0 : i64, scratch_operands = 0 : i64, tpu.core_type = #tpu.core_type<tc>, window_params = [{transform_indices = @transform_0, window_bounds = array<i64: 256, 36>}, {pipeline_mode = #tpu.pipeline_mode<synchronous>, transform_indices = @transform_1, window_bounds = array<i64: 36, 128>}, {transform_indices = @transform_2, window_bounds = array<i64: 8, 128>}]} {
    %c0 = arith.constant 0 : index
    %c0_0 = arith.constant 0 : index
    %0 = vector.load %arg1[%c0, %c0_0] : memref<256x36xbf16, #tpu.memory_space<vmem>>, vector<256x36xbf16>
    %c0_1 = arith.constant 0 : index
    %c0_2 = arith.constant 0 : index
    %1 = vector.load %arg2[%c0_1, %c0_2] : memref<36x128xbf16, #tpu.memory_space<vmem>>, vector<36x128xbf16>
    %cst = arith.constant dense<0.000000e+00> : vector<256x128xf32>
    %2 = tpu.matmul %0, %1, %cst {dimension_numbers = #tpu.dot_dimension_numbers<[1], [0], [0], [1], [0, 0, 1, 1], [], []>} : vector<256x36xbf16>, vector<36x128xbf16>, vector<256x128xf32> -> vector<256x128xf32>
    %cst_3 = arith.constant dense<0.000000e+00> : vector<128xf32>
    %3 = vector.multi_reduction <add>, %2, %cst_3 [0] : vector<256x128xf32> to vector<128xf32>
    %4 = vector.shape_cast %3 : vector<128xf32> to vector<1x128xf32>
    %5 = arith.mulf %2, %2 : vector<256x128xf32>
    %cst_4 = arith.constant dense<0.000000e+00> : vector<128xf32>
    %6 = vector.multi_reduction <add>, %5, %cst_4 [0] : vector<256x128xf32> to vector<128xf32>
    %7 = vector.shape_cast %6 : vector<128xf32> to vector<1x128xf32>
    %8 = tpu.iota {dimensions = array<i32: 0>} : vector<8x128xi32>
    %c0_i32 = arith.constant 0 : i32
    %9 = vector.broadcast %c0_i32 : i32 to vector<8x128xi32>
    %10 = arith.cmpi eq, %8, %9 : vector<8x128xi32>
    %c1_i32 = arith.constant 1 : i32
    %11 = vector.broadcast %c1_i32 : i32 to vector<8x128xi32>
    %12 = arith.cmpi eq, %8, %11 : vector<8x128xi32>
    %cst_5 = arith.constant 0.000000e+00 : f32
    %13 = vector.shape_cast %7 : vector<1x128xf32> to vector<1x128xf32>
    %14 = vector.broadcast %13 : vector<1x128xf32> to vector<8x128xf32>
    %15 = vector.broadcast %cst_5 : f32 to vector<8x128xf32>
    %16 = arith.select %12, %14, %15 : vector<8x128xi1>, vector<8x128xf32>
    %17 = vector.shape_cast %4 : vector<1x128xf32> to vector<1x128xf32>
    %18 = vector.broadcast %17 : vector<1x128xf32> to vector<8x128xf32>
    %19 = arith.select %10, %18, %16 : vector<8x128xi1>, vector<8x128xf32>
    %c0_6 = arith.constant 0 : index
    %c0_7 = arith.constant 0 : index
    %20 = vector.load %arg3[%c0_6, %c0_7] : memref<8x128xf32, #tpu.memory_space<vmem>>, vector<8x128xf32>
    tpu.vector_store %arg3[%c0_6, %c0_7], %19 {strides = array<i32>} : memref<8x128xf32, #tpu.memory_space<vmem>>, vector<8x128xf32>,
    return
  }
  func.func @transform_0(%arg0: i32) -> (i32, i32) {
    %c0_i32 = arith.constant 0 : i32
    %c0_i32_0 = arith.constant 0 : i32
    return %arg0, %c0_i32 : i32, i32
  }
  func.func @transform_1(%arg0: i32) -> (i32, i32) {
    %c0_i32 = arith.constant 0 : i32
    %c0_i32_0 = arith.constant 0 : i32
    %c0_i32_1 = arith.constant 0 : i32
    return %c0_i32, %c0_i32_0 : i32, i32
  }
  func.func @transform_2(%arg0: i32) -> (i32, i32) {
    %c0_i32 = arith.constant 0 : i32
    %c0_i32_0 = arith.constant 0 : i32
    return %arg0, %c0_i32 : i32, i32
  }
}

</mosaic_0001>

<bundles_post_ra>
// kernel: tpu_custom_call.1
= control target key start
LH: loop header
LB: loop body
LE: loop exit
PB: predicated region body
PF: predicated region fallthrough
CT: control target
= control target key end

     0   :  { %7 = vsyncpa [#allocation3], 0  ;;  %s1079_s0 = inlined_call_operand.vmem [shape: bf16[512,36], index: 0, kind: input, shape index: {}]   ;;  %s1080_s1 = inlined_call_operand.vmem [shape: bf16[36,128], index: 1, kind: input, shape index: {}]   ;;  %s1081_s2 = inlined_call_operand.hbm [shape: f32[16,128], index: 2, kind: output, shape index: {}]  }
   0x1   :  { %9 = vsyncpa [#allocation3 + $0x1], 0  ;;  %s924_s9 = smov 0   ;;  %s926_s10 = smov 0  }
   0x2   :  { %s928_s11 = smov 0   ;;  %s930_s12 = smov 0  }
   0x3 LB: > { %s945_s13 = sadd.s32 4294967295, %s906_s12   ;;  %s677_s14 = sadd.s32 4294967294, %s906_s12   ;;  %s906_s12 = sphi %s930_s12, %s1087_s12   ;;  %s902_s11 = sphi %s928_s11, %s1086_s11   ;;  %s898_s10 = sphi %s926_s10, %s1085_s10   ;;  %s894_s9 = sphi %s924_s9, %s1084_s9  }
   0x4   : > { %s949_s15 = sadd.s32 1, %s906_s12   ;;  %s69_s16 = sadd.s32 1, %s902_s11 }
   0x5   : > { %s66_s17 = ssub.s32 %s906_s12, %s949_s15  ;;  %p79_p0 = scmp.ne.s32.totalorder %s902_s11, %s898_s10 }
   0x6   : > { %p67_p1 = scmp.eq.s32.totalorder %s66_s17, 0  ;;  %p80_p2 = scmp.eq.s32.totalorder %s945_s13, 1 }
   0x7   : > { %p85_p3 = scmp.ne.s32.totalorder %s898_s10, %s894_s9  ;;  %p86_p4 = scmp.eq.s32.totalorder %s677_s14, 1 }
   0x8   : > { %s960_s18 = scalar_select %p67_p1, %s902_s11, %s69_s16  }
   0x9   : > { %p962_p5 = por %p80_p2, %p79_p0  ;;  %p966_p6 = por %p86_p4, %p85_p3 }
   0xa   : > { %p680_p7 = scmp.ge.s32.totalorder %s906_s12, 1  ;;  %p116_p8 = scmp.lt.s32.totalorder %s906_s12, 3 }
   0xc   : > { %p117_p9 = pnand %p680_p7, %p116_p8 }
   0xd   : > { %s682_s25 = sshll.u32 (!%p117_p9), %s945_s13, 5  ;;  %s135_s4 = sand.u32 (!%p117_p9), 1, %s898_s10  }
   0xe   : > { %120 = sbr.rel (%p117_p9) target bundleno = 322 (0x142), region = 28  ;;  %p139_p10 = scmp.lt.s32.totalorder (!%p117_p9), %s682_s25, 63 }
   0xf   : > { %s681_s5 = sshll.u32 (!%p117_p9), %s135_s4, 3  ;;  %s720_s6 = sshll.u32 (!%p117_p9), %s945_s13, 7 }
  0x10   : > { %s137_s7 = scalar_lea.vmem (!%p117_p9), [#allocation2], %s681_s5  ;;  %s1044_s17 = scalar_lea.hbm (!%p117_p9), %s1081_s2, %s720_s6 }
  0x11   : > { %s618_s8 = sshll.u32 (!%p117_p9), %s137_s7, 4  ;;  %s605_s21 = scalar_lea.sflag (!%p117_p9), [#allocation3], %s135_s4  ;;  %s619_s8 = int_to_ptr.vmem [resolvable:$true] %s618_s8 }
  0x12   : > { %s846_s22 = scalar_lea.vmem (!%p117_p9), %s619_s8, 128  ;;  %s908_s13 = smov (!%p117_p9), [#allocation2]  }
  0x13   : > { %v827_v0 = vld [vmem:[%s1080_s1 + $0x10] ss:$0 sps:$4 sm:$0x33]   ;;  %vm326_vm0 = vcmask 1041408   ;;  %v828_v1 = vld [vmem:[%s1080_s1 + $0x8] sm:$0xff]   ;;  %v829_v3 = vld [vmem:[%s1080_s1] sm:$0xff]   ;;  %p847_p11 = scmp.ne.s32.totalorder %s619_s8, %s846_s22 }
  0x14   : > { %786 = vmatprep.subr.msk.bf16.mxu0 %vm326_vm0, %v827_v0  ;;  %v328_v2 = vsel %vm326_vm0, %v827_v0, 0  ;;  %787 = vmatprep.subr.msk.bf16.mxu1 %vm326_vm0, %v827_v0  ;;  %s1089_s25 = smov (!%p139_p10, %s682_s25), 63  ;;  %vm277_vm1 = vcmask 293888   ;;  %s850_s23 = sshll.u32 %s908_s13, 4  ;;  %s851_s23 = int_to_ptr.vmem [resolvable:$false] %s850_s23 }
  0x15   : > { %743 = vmatpush3.bf16.msra.mxu0 %v328_v2  ;;  %783 = vmatpush3.bf16.msra.mxu1 %v328_v2  ;;  %s683_s28 = sshll.u32 %s1089_s25, 2  ;;  %p848_p12 = pnand %p847_p11, %p962_p5 }
  0x16   : > { %744 = vmatprep.subr.bf16.mxu0 %v828_v1  ;;  %781 = vmatprep.subr.bf16.mxu1 %v828_v1  ;;  %s985_s3 = scalar_lea.vmem %s1079_s0, %s683_s28  ;;  %s852_s24 = scalar_lea.vmem %s851_s23, 256 }
  0x17   : > { %v830_v4 = vld [vmem:[%s985_s3] sm:$0xff]   ;;  %v831_v5 = vld [vmem:[%s985_s3 + $0x8] sm:$0xff]   ;;  %v832_v6 = vld [vmem:[%s985_s3 + $0x10] sm:$0xff]   ;;  %p849_p13 = pneg %p848_p12  ;;  %p853_p0 = scmp.lt.s32.totalorder %s619_s8, %s851_s23 }
  0x18   : > { %748 = vmatprep.mubr.msk.bf16.mxu0 %vm277_vm1, %v830_v4  ;;  %v833_v7 = vld [vmem:[%s985_s3 + $0x18] sm:$0xff]   ;;  %v834_v8 = vld [vmem:[%s985_s3 + $0x20] sm:$0xff]   ;;  %v839_v10 = vld [vmem:[%s985_s3 + $0x48] sm:$0xff]   ;;  %p854_p1 = scmp.lt.s32.totalorder %s852_s24, %s846_s22 }
  0x19   : > { %745 = vmatpush3.bf16.msra.mxu0 %v828_v1  ;;  %784 = vmatpush3.bf16.msra.mxu1 %v828_v1  ;;  %v838_v9 = vld [vmem:[%s985_s3 + $0x40] sm:$0xff]   ;;  %v840_v11 = vld [vmem:[%s985_s3 + $0x50] sm:$0xff]   ;;  %v841_v12 = vld [vmem:[%s985_s3 + $0x58] sm:$0xff]  }
  0x1a   : > { %746 = vmatprep.subr.bf16.mxu0 %v829_v3  ;;  %782 = vmatprep.subr.bf16.mxu1 %v829_v3  ;;  %v842_v13 = vld [vmem:[%s985_s3 + $0x60] sm:$0xff]   ;;  %v835_v14 = vld [vmem:[%s985_s3 + $0x28] sm:$0xff]   ;;  %v836_v15 = vld [vmem:[%s985_s3 + $0x30] sm:$0xff]   ;;  %p855_p2 = por %p854_p1, %p853_p0 }
  0x1b   : > { %764 = vmatprep.mubr.msk.bf16.mxu1 %vm277_vm1, %v838_v9  ;;  %v843_v16 = vld [vmem:[%s985_s3 + $0x68] sm:$0xff]   ;;  %v844_v17 = vld [vmem:[%s985_s3 + $0x70] sm:$0xff]   ;;  %v837_v18 = vld [vmem:[%s985_s3 + $0x38] sm:$0xff]  }
  0x1c   : > { %v845_v19 = vld [vmem:[%s985_s3 + $0x78] sm:$0xff]   ;;  %p856_p3 = pnand %p855_p2, %p849_p13 }
  0x1d   : > { %747 = vmatpush3.bf16.msra.mxu0 %v829_v3  ;;  %785 = vmatpush3.bf16.msra.mxu1 %v829_v3 }
  0x20   : > { %749 = vmatmul.mubr.msk.bf16.vlgmr.msra.gmra.mxu0 %vm277_vm1, %v831_v5  ;;  %765 = vmatmul.mubr.msk.bf16.vlgmr.msra.gmra.mxu1 %vm277_vm1, %v839_v10 }
  0x21   : > { %752 = vmatprep.mubr.msk.bf16.mxu0 %vm277_vm1, %v832_v6  ;;  %768 = vmatprep.mubr.msk.bf16.mxu1 %vm277_vm1, %v840_v11 }
  0x28   : > { %753 = vmatmul.mubr.msk.bf16.gmra.mxu0 %vm277_vm1, %v833_v7  ;;  %769 = vmatmul.mubr.msk.bf16.gmra.mxu1 %vm277_vm1, %v841_v12 }
  0x29   : > { %756 = vmatprep.mubr.msk.bf16.mxu0 %vm277_vm1, %v834_v8  ;;  %772 = vmatprep.mubr.msk.bf16.mxu1 %vm277_vm1, %v842_v13 }
  0x30   : > { %757 = vmatmul.mubr.msk.bf16.gmra.mxu0 %vm277_vm1, %v835_v14  ;;  %773 = vmatmul.mubr.msk.bf16.gmra.mxu1 %vm277_vm1, %v843_v16 }
  0x31   : > { %760 = vmatprep.mubr.msk.bf16.mxu0 %vm277_vm1, %v836_v15  ;;  %776 = vmatprep.mubr.msk.bf16.mxu1 %vm277_vm1, %v844_v17 }
  0x38   : > { %761 = vmatmul.mubr.msk.bf16.gmra.mxu0 %vm277_vm1, %v837_v18  ;;  %777 = vmatmul.mubr.msk.bf16.gmra.mxu1 %vm277_vm1, %v845_v19 }
  0xe0   : > { %v750_v20 = vpop.f32.mrf.mxu0  ;;  %v1019_v24 = vpop.f32.mrf.mxu1 }
  0xe1   : > { %v530_v30 = vmul.f32 %v750_v20, %v750_v20 }
  0xe2   : > { %v364_v21 = vpop.f32.mrf.mxu0  ;;  %v1021_v29 = vpop.f32.mrf.mxu1 }
  0xe3   : > { %v528_v25 = vmul.f32 %v364_v21, %v364_v21 }
  0xe4   : > { %v751_v22 = vpop.f32.mrf.mxu0  ;;  %v1023_v34 = vpop.f32.mrf.mxu1 }
  0xe5   : > { %v531_v35 = vmul.f32 %v751_v22, %v751_v22 }
  0xe6   : > { %v367_v23 = vpop.f32.mrf.mxu0  ;;  %v431_v39 = vpop.f32.mrf.mxu1 }
  0xe7   : > { %v491_v26 = vadd.f32 %v367_v23, %v364_v21  ;;  %v529_v27 = vmul.f32 %v367_v23, %v367_v23 }
  0xe8   : > { %v754_v28 = vpop.f32.mrf.mxu0  ;;  %v1025_v48 = vpop.f32.mrf.mxu1 }
  0xe9   : > { %v492_v31 = vadd.f32 %v750_v20, %v491_v26  ;;  %v560_v32 = vadd.f32 %v529_v27, %v528_v25  ;;  %v534_v49 = vmul.f32 %v754_v28, %v754_v28 }
  0xea   : > { %v380_v33 = vpop.f32.mrf.mxu0  ;;  %v444_v57 = vpop.f32.mrf.mxu1 }
  0xeb   : > { %v561_v36 = vadd.f32 %v560_v32, %v530_v30  ;;  %v493_v37 = vadd.f32 %v751_v22, %v492_v31  ;;  %v532_v41 = vmul.f32 %v380_v33, %v380_v33 }
  0xec   : > { %v755_v38 = vpop.f32.mrf.mxu0  ;;  %v771_v2 = vpop.f32.mrf.mxu1 }
  0xed   : > { %v494_v40 = vadd.f32 %v493_v37, %v380_v33  ;;  %v562_v42 = vadd.f32 %v561_v36, %v531_v35  ;;  %v535_v53 = vmul.f32 %v755_v38, %v755_v38  ;;  %v545_v33 = vmul.f32 %v431_v39, %v431_v39 }
  0xee   : > { %v383_v43 = vpop.f32.mrf.mxu0  ;;  %v447_v11 = vpop.f32.mrf.mxu1  ;;  %v546_v37 = vmul.f32 %v1019_v24, %v1019_v24 }
  0xef   : > { %v563_v44 = vadd.f32 %v562_v42, %v532_v41  ;;  %v495_v45 = vadd.f32 %v494_v40, %v383_v43  ;;  %v533_v46 = vmul.f32 %v383_v43, %v383_v43  ;;  %v547_v41 = vmul.f32 %v1023_v34, %v1023_v34 }
  0xf0   : > { %v758_v47 = vpop.f32.mrf.mxu0  ;;  %v774_v19 = vpop.f32.mrf.mxu1 }
  0xf1   : > { %v496_v50 = vadd.f32 %v754_v28, %v495_v45  ;;  %v564_v51 = vadd.f32 %v563_v44, %v533_v46  ;;  %v538_v3 = vmul.f32 %v758_v47, %v758_v47  ;;  %v544_v28 = vmul.f32 %v1021_v29, %v1021_v29 }
  0xf2   : > { %v396_v52 = vpop.f32.mrf.mxu0  ;;  %v460_v27 = vpop.f32.mrf.mxu1  ;;  %v548_v46 = vmul.f32 %v444_v57, %v444_v57 }
  0xf3   : > { %v565_v54 = vadd.f32 %v564_v51, %v534_v49  ;;  %v497_v55 = vadd.f32 %v755_v38, %v496_v50  ;;  %v536_v59 = vmul.f32 %v396_v52, %v396_v52  ;;  %v549_v49 = vmul.f32 %v447_v11, %v447_v11 }
  0xf4   : > { %v759_v56 = vpop.f32.mrf.mxu0  ;;  %v775_v36 = vpop.f32.mrf.mxu1  ;;  %v550_v51 = vmul.f32 %v1025_v48, %v1025_v48 }
  0xf5   : > { %v498_v58 = vadd.f32 %v497_v55, %v396_v52  ;;  %v566_v60 = vadd.f32 %v565_v54, %v535_v53  ;;  %v539_v7 = vmul.f32 %v759_v56, %v759_v56  ;;  %v551_v53 = vmul.f32 %v771_v2, %v771_v2 }
  0xf6   : > { %v399_v61 = vpop.f32.mrf.mxu0  ;;  %v463_v44 = vpop.f32.mrf.mxu1 }
  0xf7   : > { %v567_v62 = vadd.f32 %v566_v60, %v536_v59  ;;  %v499_v63 = vadd.f32 %v498_v58, %v399_v61  ;;  %v537_v0 = vmul.f32 %v399_v61, %v399_v61  ;;  %v553_v61 = vmul.f32 %v463_v44, %v463_v44 }
  0xf8   : > { %v762_v1 = vpop.f32.mrf.mxu0  ;;  %v778_v50 = vpop.f32.mrf.mxu1 }
  0xf9   : > { %v500_v4 = vadd.f32 %v758_v47, %v499_v63  ;;  %v568_v5 = vadd.f32 %v567_v62, %v537_v0  ;;  %v542_v20 = vmul.f32 %v762_v1, %v762_v1  ;;  %v554_v63 = vmul.f32 %v774_v19, %v774_v19 }
  0xfa   : > { %v412_v6 = vpop.f32.mrf.mxu0 }
  0xfb   : > { %v569_v8 = vadd.f32 %v568_v5, %v538_v3  ;;  %v501_v9 = vadd.f32 %v759_v56, %v500_v4  ;;  %v540_v13 = vmul.f32 %v412_v6, %v412_v6  ;;  %v476_v56 = vpop.f32.mrf.mxu1  ;;  %v555_v3 = vmul.f32 %v775_v36, %v775_v36 }
  0xfc   : > { %v763_v10 = vpop.f32.mrf.mxu0 }
  0xfd   : > { %v502_v12 = vadd.f32 %v501_v9, %v412_v6  ;;  %v570_v14 = vadd.f32 %v569_v8, %v539_v7  ;;  %v543_v23 = vmul.f32 %v763_v10, %v763_v10  ;;  %v779_v62 = vpop.f32.mrf.mxu1  ;;  %v556_v7 = vmul.f32 %v476_v56, %v476_v56 }
  0xfe   : > { %v415_v15 = vpop.f32.mrf.mxu0 }
  0xff   : > { %v571_v16 = vadd.f32 %v570_v14, %v540_v13  ;;  %v503_v17 = vadd.f32 %v502_v12, %v415_v15  ;;  %v541_v18 = vmul.f32 %v415_v15, %v415_v15  ;;  %v479_v6 = vpop.f32.mrf.mxu1  ;;  %v559_v14 = vmul.f32 %v779_v62, %v779_v62 }
 0x101   : > { %v504_v21 = vadd.f32 %v762_v1, %v503_v17  ;;  %v572_v22 = vadd.f32 %v571_v16, %v541_v18 }
 0x103   : > { %v505_v25 = vadd.f32 %v763_v10, %v504_v21  ;;  %v573_v26 = vadd.f32 %v572_v22, %v542_v20  ;;  %v557_v10 = vmul.f32 %v479_v6, %v479_v6  ;;  %v597_v21 = vlaneseq }
 0x105   : > { %v574_v30 = vadd.f32 %v573_v26, %v543_v23  ;;  %v506_v31 = vadd.f32 %v505_v25, %v1021_v29 }
 0x107   : > { %v507_v32 = vadd.f32 %v506_v31, %v431_v39  ;;  %v575_v35 = vadd.f32 %v574_v30, %v544_v28 }
 0x109   : > { %v508_v38 = vadd.f32 %v1019_v24, %v507_v32  ;;  %v576_v40 = vadd.f32 %v575_v35, %v545_v33 }
 0x10b   : > { %v577_v42 = vadd.f32 %v576_v40, %v546_v37  ;;  %v509_v43 = vadd.f32 %v1023_v34, %v508_v38  ;;  %v552_v34 = vmul.f32 %v460_v27, %v460_v27 }
 0x10d   : > { %v510_v45 = vadd.f32 %v509_v43, %v444_v57  ;;  %v578_v29 = vadd.f32 %v577_v42, %v547_v41 }
 0x10f   : > { %v579_v47 = vadd.f32 %v578_v29, %v548_v46  ;;  %v511_v39 = vadd.f32 %v510_v45, %v447_v11  ;;  %v558_v11 = vmul.f32 %v778_v50, %v778_v50 }
 0x111   : > { %v512_v24 = vadd.f32 %v1025_v48, %v511_v39  ;;  %v580_v52 = vadd.f32 %v579_v47, %v549_v49 }
 0x113   : > { %v581_v54 = vadd.f32 %v580_v52, %v550_v51  ;;  %v513_v55 = vadd.f32 %v771_v2, %v512_v24 }
 0x115   : > { %v514_v58 = vadd.f32 %v513_v55, %v460_v27  ;;  %v582_v59 = vadd.f32 %v581_v54, %v551_v53  ;;  %v598_v27 = vshrl.u32 %v597_v21, 7 }
 0x117   : > { %v583_v60 = vadd.f32 %v582_v59, %v552_v34  ;;  %v515_v57 = vadd.f32 %v514_v58, %v463_v44  ;;  %vm600_vm2 = vcmp.eq.s32.totalorder %v598_v27, 1  ;;  %vm599_vm3 = vcmp.eq.s32.totalorder %v598_v27, 0 }
 0x119   : > { %v516_v0 = vadd.f32 %v774_v19, %v515_v57  ;;  %v584_v1 = vadd.f32 %v583_v60, %v553_v61 }
 0x11b   : > { %v585_v4 = vadd.f32 %v584_v1, %v554_v63  ;;  %v517_v5 = vadd.f32 %v775_v36, %v516_v0 }
 0x11d   : > { %v518_v48 = vadd.f32 %v517_v5, %v476_v56  ;;  %v586_v8 = vadd.f32 %v585_v4, %v555_v3 }
 0x11f   : > { %v587_v2 = vadd.f32 %v586_v8, %v556_v7  ;;  %v519_v9 = vadd.f32 %v518_v48, %v479_v6 }
 0x121   : > { %v520_v12 = vadd.f32 %v778_v50, %v519_v9  ;;  %v588_v13 = vadd.f32 %v587_v2, %v557_v10 }
 0x123   : > { %v521_v15 = vadd.f32 %v779_v62, %v520_v12  ;;  %v589_v16 = vadd.f32 %v588_v13, %v558_v11 }
 0x125   : > { %v522_v17 = vrot.slane %v521_v15, 4  ;;  %v590_v18 = vadd.f32 %v589_v16, %v559_v14 }
 0x127   : > { %v523_v19 = vadd.f32 %v522_v17, %v521_v15  ;;  %v591_v20 = vrot.slane %v590_v18, 4 }
 0x129   : > { %v524_v22 = vrot.slane %v523_v19, 2  ;;  %v592_v23 = vadd.f32 %v591_v20, %v590_v18 }
 0x12b   : > { %v525_v25 = vadd.f32 %v524_v22, %v523_v19  ;;  %v593_v26 = vrot.slane %v592_v23, 2 }
 0x12d   : > { %v594_v28 = vadd.f32 %v593_v26, %v592_v23  ;;  %v526_v30 = vrot.slane %v525_v25, 1 }
 0x12f   : > { %v595_v31 = vrot.slane %v594_v28, 1  ;;  %v527_v33 = vadd.f32 %v526_v30, %v525_v25 }
 0x131   : > { %v596_v32 = vadd.f32 %v595_v31, %v594_v28 }
 0x133   : > { %v601_v35 = vsel %vm600_vm2, %v596_v32, 0.0 }
 0x134   : > { %v602_v36 = vsel %vm599_vm3, %v527_v33, %v601_v35 }
 0x135   : > { %603 = vst [vmem:[%s137_s7] sm:$0xff] %v602_v36 }
 0x136   : > { %859 = shalt.err (!%p856_p3)
}
 0x137   : > { %s860_s25 = scalar_lea.hbm %s1044_s17, 128  ;;  %s864_s28 = scalar_lea.hbm %s1081_s2, 256 }
 0x138   : > { %p861_p4 = scmp.ne.s32.totalorder %s1044_s17, %s860_s25  ;;  %p865_p9 = scmp.lt.s32.totalorder %s1044_s17, %s1081_s2 }
 0x139   : > { %p866_p10 = scmp.lt.s32.totalorder %s864_s28, %s860_s25 }
 0x13a   : > { %p862_p7 = pnand %p861_p4, %p962_p5 }
 0x13b   : > { %p867_p11 = por %p866_p10, %p865_p9 }
 0x13c   : > { %p863_p8 = pneg %p862_p7 }
 0x13e   : > { %p868_p12 = pnand %p867_p11, %p863_p8 }
 0x140   : > { %871 = shalt.err (!%p868_p12)
}
 0x141   : > { %788 = dma.vmem_to_hbm [thread:$0]  (%p962_p5), %s619_s8, 128, %s1044_s17, %s605_s21  }
 0x142 PF: > { %p794_p13 = scmp.ge.s32.totalorder %s906_s12, 2  ;;  %s630_s3 = sand.u32 1, %s894_s9  }
 0x143   : > { %s631_s4 = scalar_lea.sflag [#allocation3], %s630_s3 }
 0x144   : > { %p791_p0 = pnand %p794_p13, %p966_p6 }
 0x146   : > { %p792_p1 = pneg %p791_p0 }
 0x148   : > { %889 = dma.done.wait (%p792_p1), %s631_s4, 128  }
 0x149   : > { %891 = vsyncadd (%p792_p1), %s631_s4, 4294967168  ;;  %p12_p2 = scmp.ge.s32.totalorder %s949_s15, 4   ;;  %s1084_s9 = smov %s898_s10 }
 0x14a   : > { %s1085_s10 = smov %s902_s11  ;;  %s1086_s11 = smov %s960_s18 }
 0x14b   : > { %s1087_s12 = smov %s949_s15  ;;  %14 = sbr.rel (!%p12_p2) target bundleno = 3 (0x3), region = 63 }
 0x150   :  { %636 = vsyncpa [#allocation3], 1 }
 0x151   :  { %638 = vsyncpa [#allocation3 + $0x1], 1 }

</bundles_post_ra>
